<compile_context>
chip_gen: v6e
topology: v6e:2x2x1
jax: 0.10.0
libtpu: 0.0.40
codegen_flags: <defaults>
</compile_context>

<pallas_src>
import functools

import jax
import jax.numpy as jnp
from jax.experimental import pallas as pl
from jax.experimental.pallas import tpu as pltpu


def _round_up(x, m):
    return (x + m - 1) // m * m


def _conv1d_kernel_k1(x_ref, w_ref, b_ref, o_ref):
    """kernel_size == 1: no halo, no scratch, single matmul."""
    acc = jnp.dot(x_ref[0], w_ref[0], preferred_element_type=jnp.float32)
    acc = acc + b_ref[...].astype(jnp.float32)
    o_ref[0] = acc.astype(o_ref.dtype)


def _conv1d_kernel(x_ref, h_ref, w_ref, b_ref, o_ref, xh_ref, *, kernel_size, dilation):
    """One (c_out-tile, batch, time-tile) grid step.

    x_ref : (1, TILE_T, C_in)      main input rows for this output tile
    h_ref : (1, HALO_BLK, C_in)    right-halo rows (head of the next tile)
    w_ref : (K, C_in, TILE_N)      tap-major conv weight slice
    b_ref : (1, TILE_N)            bias slice
    o_ref : (1, TILE_T, TILE_N)    output tile
    xh_ref: (TILE_T+HALO_BLK, C_in) VMEM staging buffer (tile + halo, contiguous)
    """
    tile_t = o_ref.shape[1]
    halo_blk = h_ref.shape[1]

    # Stage tile + halo contiguously; both stores start at sublane-aligned rows.
    xh_ref[0:tile_t, :] = x_ref[0]
    xh_ref[tile_t:tile_t + halo_blk, :] = h_ref[0]

    # K accumulating matmuls (f32 accumulation); LHS slices are shifted loads only,
    # no materialized im2col copies.
    acc = jnp.dot(xh_ref[0:tile_t, :], w_ref[0], preferred_element_type=jnp.float32)
    for k in range(1, kernel_size):
        off = k * dilation
        acc = acc + jnp.dot(xh_ref[off:off + tile_t, :], w_ref[k],
                            preferred_element_type=jnp.float32)

    acc = acc + b_ref[...].astype(jnp.float32)
    o_ref[0] = acc.astype(o_ref.dtype)


def conv_forward(x, weight, bias=None, *, stride=1, padding=0, dilation=1,
                 tile_t=256, tile_n=256):
    """Forward pass of the `Conv` module.

    x:      (B, T, C_in)          channels-last (module's external layout)
    weight: (C_out, C_in, K)      PyTorch Conv1d weight layout
    bias:   (C_out,) or None
    returns (B, T_out, C_out) with T_out = T + 2*padding - dilation*(K-1)   (stride=1)

    Note: `tile_t=256` is sized for v7x's 64 MiB VMEM; v6e (128 MiB) can pass 512.
    """
    assert stride == 1  # TODO(synk): strided output subsampling not implemented
    B, T, C_in = x.shape
    C_out, C_in_w, K = weight.shape
    assert C_in_w == C_in
    if bias is None:
        bias = jnp.zeros((C_out,), x.dtype)

    halo = dilation * (K - 1)
    T_out = T + 2 * padding - halo
    assert T_out > 0

    # ---- output-channel tiling (bounds resident-weight VMEM) ----
    if C_out <= tile_n:
        TILE_N = C_out                       # full-dim block (lane-masked if <128)
    else:
        TILE_N = _round_up(tile_n, 128)      # lane-dense tiles
    nb_n = pl.cdiv(C_out, TILE_N)

    # ---- time tiling ----
    def _time_tiles(req):
        tt = min(_round_up(req, 8), _round_up(T_out, 8))
        tt = max(tt, _round_up(max(halo, 8), 8))
        hb = _round_up(max(halo, 1), 8)
        while tt % hb:                       # halo block must divide the tile
            hb += 8
        return tt, hb, pl.cdiv(T_out, tt)

    TILE_T, HALO_BLK, nb_t = _time_tiles(tile_t)
    # v7x megacore: guarantee >= 2 parallel grid steps when possible.
    if B * nb_t * nb_n == 1 and T_out > 8:
        tt2, hb2, nt2 = _time_tiles(pl.cdiv(T_out, 2))
        if nt2 >= 2:
            TILE_T, HALO_BLK, nb_t = tt2, hb2, nt2
    halo_stride = TILE_T // HALO_BLK

    # Time-only zero pad (conv padding + tile/halo slack).  Channels are NOT padded,
    # so this copy is ~1x the input, not 16x.
    # TODO(synk): fold the time pad into the kernel (clamped index_map + pl.when masks).
    T_pad = nb_t * TILE_T + HALO_BLK
    x_pad = jnp.pad(x, ((0, 0), (padding, T_pad - T - padding), (0, 0)))

    # Weight: (C_out, C_in, K) -> (K, C_in, C_out); matmul dtype = activation dtype
    # (pass bf16 activations to feed the MXU at full rate; accumulation stays f32).
    w = jnp.transpose(weight, (2, 1, 0)).astype(x.dtype)
    b2 = bias.reshape(1, C_out)

    if K == 1:
        kernel = _conv1d_kernel_k1
        scratch_shapes = []
    else:
        kernel = functools.partial(_conv1d_kernel, kernel_size=K, dilation=dilation)
        scratch_shapes = [pltpu.VMEM((TILE_T + HALO_BLK, C_in), x.dtype)]

    xb = jnp.dtype(x.dtype).itemsize
    wb = jnp.dtype(w.dtype).itemsize
    vmem_est = (2 * (TILE_T + HALO_BLK) * C_in * xb    # x + halo tiles (double buffered)
                + K * C_in * TILE_N * wb               # resident weight (single buffer)
                + 2 * TILE_T * TILE_N * xb             # output tile (double buffered)
                + (TILE_T + HALO_BLK) * C_in * xb      # staging scratch
                + TILE_T * TILE_N * 4)                 # f32 accumulator headroom
    vmem_limit = int(min(max(2 * vmem_est, 32 * 2**20), 56 * 2**20))

    cost = pl.CostEstimate(
        flops=2 * B * T_out * K * C_in * C_out,
        transcendentals=0,
        bytes_accessed=(nb_n * B * T_pad * C_in * xb      # x re-read once per C_out tile
                        + K * C_in * C_out * wb + C_out * wb
                        + B * T_out * C_out * xb))

    def _build(wspec_extra):
        # grid = (C_out tiles, batch, time tiles): weight/bias blocks only change
        # with n (outermost), so they stay resident across the whole inner sweep.
        in_specs = [pl.BlockSpec((1, TILE_T, C_in), lambda n, b, t: (b, t, 0))]
        operands = [x_pad]
        if K > 1:
            in_specs.append(pl.BlockSpec((1, HALO_BLK, C_in),
                                         lambda n, b, t: (b, (t + 1) * halo_stride, 0)))
            operands.append(x_pad)
        in_specs.append(pl.BlockSpec((K, C_in, TILE_N), lambda n, b, t: (0, 0, n),
                                     **wspec_extra))
        in_specs.append(pl.BlockSpec((1, TILE_N), lambda n, b, t: (0, n),
                                     **wspec_extra))
        operands += [w, b2]

        return pl.pallas_call(
            kernel,
            out_shape=jax.ShapeDtypeStruct((B, T_out, C_out), x.dtype),
            grid_spec=pltpu.PrefetchScalarGridSpec(
                num_scalar_prefetch=0,
                grid=(nb_n, B, nb_t),
                in_specs=in_specs,
                out_specs=pl.BlockSpec((1, TILE_T, TILE_N),
                                       lambda n, b, t: (b, t, n)),
                scratch_shapes=scratch_shapes),
            compiler_params=pltpu.CompilerParams(
                dimension_semantics=("parallel", "parallel", "parallel"),
                vmem_limit_bytes=vmem_limit),
            cost_estimate=cost,
        )(*operands)

    try:
        # Weight/bias never change within a C_out tile: single-buffer them to halve
        # their resident VMEM footprint (matters on v7x's 64 MiB / v5e's 16 MiB scoped).
        return _build(dict(pipeline_mode=pl.Buffered(1)))
    except Exception:
        # Fallback for Pallas versions without per-spec pipeline_mode support.
        return _build({})


# ----------------------------- reference & tests -----------------------------

def _reference_conv(x, weight, bias, *, padding, dilation):
    # Pure-JAX reference: NCL conv exactly like nn.Conv1d, then transpose back.
    x_ncl = jnp.transpose(x.astype(jnp.float32), (0, 2, 1))       # (B, C_in, T)
    y = jax.lax.conv_general_dilated(
        x_ncl, weight.astype(jnp.float32),
        window_strides=(1,),
        padding=[(padding, padding)],
        rhs_dilation=(dilation,),
        dimension_numbers=("NCH", "OIH", "NCH"))
    y = y + bias.astype(jnp.float32)[None, :, None]
    return jnp.transpose(y, (0, 2, 1))                            # (B, T_out, C_out)


def _make_params(key, C_in, C_out, K):
    kw, kb = jax.random.split(key)
    bound = 1.0 / jnp.sqrt(jnp.array(C_in * K, jnp.float32))
    weight = jax.random.uniform(kw, (C_out, C_in, K), jnp.float32, -bound, bound)
    bias = jax.random.uniform(kb, (C_out,), jnp.float32, -bound, bound)
    return weight, bias


if __name__ == "__main__":
    key = jax.random.PRNGKey(0)
    k1, k2, k3, k4, k5, k6 = jax.random.split(key, 6)

    # Test 1: FastSpeech-like small config (same-length conv), single time tile.
    B, T, C_in, C_out, K, PAD = 2, 16, 8, 16, 3, 1
    x = jax.random.normal(k1, (B, T, C_in), dtype=jnp.float32)
    weight, bias = _make_params(k2, C_in, C_out, K)
    y = jax.block_until_ready(conv_forward(x, weight, bias, padding=PAD, dilation=1))
    y_ref = _reference_conv(x, weight, bias, padding=PAD, dilation=1)
    assert y.shape == (B, T, C_out)
    assert jnp.allclose(y, y_ref, atol=1e-5, rtol=1e-5), "mismatch vs reference (test 1)"

    # Test 2: multi-tile time axis, dilation=2, and a tiled C_out axis with a
    # partial last channel block (exercises halo BlockSpec + masked stores).
    B2, T2, C_in2, C_out2, K2, PAD2, D2 = 2, 48, 16, 160, 3, 2, 2
    x2 = jax.random.normal(k3, (B2, T2, C_in2), dtype=jnp.float32)
    weight2, bias2 = _make_params(k4, C_in2, C_out2, K2)
    y2 = jax.block_until_ready(conv_forward(x2, weight2, bias2, padding=PAD2,
                                            dilation=D2, tile_t=16, tile_n=128))
    y2_ref = _reference_conv(x2, weight2, bias2, padding=PAD2, dilation=D2)
    assert y2.shape == (B2, T2, C_out2)
    assert jnp.allclose(y2, y2_ref, atol=1e-5, rtol=1e-5), "mismatch vs reference (test 2)"

    # Test 3: bf16 activations (MXU-native path), kernel_size == 1 (no halo operand),
    # B == 1 (forces the grid-split so both v7x cores get work), partial last time tile.
    B3, T3, C_in3, C_out3, K3 = 1, 40, 32, 64, 1
    x3 = jax.random.normal(k5, (B3, T3, C_in3), dtype=jnp.float32).astype(jnp.bfloat16)
    weight3, bias3 = _make_params(k6, C_in3, C_out3, K3)
    y3 = jax.block_until_ready(conv_forward(x3, weight3, bias3, padding=0, dilation=1))
    y3_ref = _reference_conv(x3, weight3, bias3, padding=0, dilation=1)
    assert y3.shape == (B3, T3, C_out3)
    assert jnp.allclose(y3.astype(jnp.float32), y3_ref, atol=5e-2, rtol=5e-2), \
        "mismatch vs reference (test 3, bf16)"

    print("KERNEL_OK")
</pallas_src>

<mosaic_0001>
module attributes {stable_mosaic.version = 11 : i64} {
  func.func @_conv1d_kernel(%arg0: i32, %arg1: i32, %arg2: i32, %arg3: memref<1x16x8xf32, #tpu.memory_space<vmem>>, %arg4: memref<1x8x8xf32, #tpu.memory_space<vmem>>, %arg5: memref<3x8x16xf32, #tpu.memory_space<vmem>>, %arg6: memref<1x16xf32, #tpu.memory_space<vmem>>, %arg7: memref<1x16x16xf32, #tpu.memory_space<vmem>>, %arg8: memref<24x8xf32, #tpu.memory_space<vmem>>) attributes {dimension_semantics = [#tpu.dimension_semantics<parallel>, #tpu.dimension_semantics<parallel>, #tpu.dimension_semantics<parallel>], iteration_bounds = array<i64: 1, 2, 1>, scalar_prefetch = 0 : i64, scratch_operands = 1 : i64, tpu.core_type = #tpu.core_type<tc>, window_params = [{transform_indices = @transform_0, window_bounds = array<i64: 1, 16, 8>}, {transform_indices = @transform_1, window_bounds = array<i64: 1, 8, 8>}, {pipeline_mode = #tpu.pipeline_mode<synchronous>, transform_indices = @transform_2, window_bounds = array<i64: 3, 8, 16>}, {pipeline_mode = #tpu.pipeline_mode<synchronous>, transform_indices = @transform_3, window_bounds = array<i64: 1, 16>}, {transform_indices = @transform_4, window_bounds = array<i64: 1, 16, 16>}]} {
    %c0 = arith.constant 0 : index
    %c0_0 = arith.constant 0 : index
    %c0_1 = arith.constant 0 : index
    %0 = vector.load %arg3[%c0, %c0_0, %c0_1] : memref<1x16x8xf32, #tpu.memory_space<vmem>>, vector<1x16x8xf32>
    %1 = vector.shape_cast %0 : vector<1x16x8xf32> to vector<16x8xf32>
    %c0_2 = arith.constant 0 : index
    %c0_3 = arith.constant 0 : index
    %2 = vector.load %arg8[%c0_2, %c0_3] : memref<24x8xf32, #tpu.memory_space<vmem>>, vector<16x8xf32>
    tpu.vector_store %arg8[%c0_2, %c0_3], %1 {strides = array<i32>} : memref<24x8xf32, #tpu.memory_space<vmem>>, vector<16x8xf32>,
    %c0_4 = arith.constant 0 : index
    %c0_5 = arith.constant 0 : index
    %c0_6 = arith.constant 0 : index
    %3 = vector.load %arg4[%c0_4, %c0_5, %c0_6] : memref<1x8x8xf32, #tpu.memory_space<vmem>>, vector<1x8x8xf32>
    %4 = vector.shape_cast %3 : vector<1x8x8xf32> to vector<8x8xf32>
    %c16 = arith.constant 16 : index
    %c0_7 = arith.constant 0 : index
    %5 = vector.load %arg8[%c16, %c0_7] : memref<24x8xf32, #tpu.memory_space<vmem>>, vector<8x8xf32>
    tpu.vector_store %arg8[%c16, %c0_7], %4 {strides = array<i32>} : memref<24x8xf32, #tpu.memory_space<vmem>>, vector<8x8xf32>,
    %c0_8 = arith.constant 0 : index
    %c0_9 = arith.constant 0 : index
    %6 = vector.load %arg8[%c0_8, %c0_9] : memref<24x8xf32, #tpu.memory_space<vmem>>, vector<16x8xf32>
    %c0_10 = arith.constant 0 : index
    %c0_11 = arith.constant 0 : index
    %c0_12 = arith.constant 0 : index
    %7 = vector.load %arg5[%c0_10, %c0_11, %c0_12] : memref<3x8x16xf32, #tpu.memory_space<vmem>>, vector<1x8x16xf32>
    %8 = vector.shape_cast %7 : vector<1x8x16xf32> to vector<8x16xf32>
    %cst = arith.constant dense<0.000000e+00> : vector<16x16xf32>
    %9 = tpu.matmul %6, %8, %cst {dimension_numbers = #tpu.dot_dimension_numbers<[1], [0], [0], [1], [0, 0, 1, 1], [], []>} : vector<16x8xf32>, vector<8x16xf32>, vector<16x16xf32> -> vector<16x16xf32>
    %c1 = arith.constant 1 : index
    %c0_13 = arith.constant 0 : index
    %10 = vector.load %arg8[%c1, %c0_13] : memref<24x8xf32, #tpu.memory_space<vmem>>, vector<16x8xf32>
    %c1_14 = arith.constant 1 : index
    %c0_15 = arith.constant 0 : index
    %c0_16 = arith.constant 0 : index
    %11 = vector.load %arg5[%c1_14, %c0_15, %c0_16] : memref<3x8x16xf32, #tpu.memory_space<vmem>>, vector<1x8x16xf32>
    %12 = vector.shape_cast %11 : vector<1x8x16xf32> to vector<8x16xf32>
    %cst_17 = arith.constant dense<0.000000e+00> : vector<16x16xf32>
    %13 = tpu.matmul %10, %12, %cst_17 {dimension_numbers = #tpu.dot_dimension_numbers<[1], [0], [0], [1], [0, 0, 1, 1], [], []>} : vector<16x8xf32>, vector<8x16xf32>, vector<16x16xf32> -> vector<16x16xf32>
    %14 = arith.addf %9, %13 : vector<16x16xf32>
    %c2 = arith.constant 2 : index
    %c0_18 = arith.constant 0 : index
    %15 = vector.load %arg8[%c2, %c0_18] : memref<24x8xf32, #tpu.memory_space<vmem>>, vector<16x8xf32>
    %c2_19 = arith.constant 2 : index
    %c0_20 = arith.constant 0 : index
    %c0_21 = arith.constant 0 : index
    %16 = vector.load %arg5[%c2_19, %c0_20, %c0_21] : memref<3x8x16xf32, #tpu.memory_space<vmem>>, vector<1x8x16xf32>
    %17 = vector.shape_cast %16 : vector<1x8x16xf32> to vector<8x16xf32>
    %cst_22 = arith.constant dense<0.000000e+00> : vector<16x16xf32>
    %18 = tpu.matmul %15, %17, %cst_22 {dimension_numbers = #tpu.dot_dimension_numbers<[1], [0], [0], [1], [0, 0, 1, 1], [], []>} : vector<16x8xf32>, vector<8x16xf32>, vector<16x16xf32> -> vector<16x16xf32>
    %19 = arith.addf %14, %18 : vector<16x16xf32>
    %c0_23 = arith.constant 0 : index
    %c0_24 = arith.constant 0 : index
    %20 = vector.load %arg6[%c0_23, %c0_24] : memref<1x16xf32, #tpu.memory_space<vmem>>, vector<1x16xf32>
    %21 = vector.broadcast %20 : vector<1x16xf32> to vector<16x16xf32>
    %22 = arith.addf %19, %21 : vector<16x16xf32>
    %c0_25 = arith.constant 0 : index
    %c0_26 = arith.constant 0 : index
    %c0_27 = arith.constant 0 : index
    %23 = vector.load %arg7[%c0_25, %c0_26, %c0_27] : memref<1x16x16xf32, #tpu.memory_space<vmem>>, vector<1x16x16xf32>
    %24 = vector.shape_cast %23 : vector<1x16x16xf32> to vector<16x16xf32>
    %25 = vector.shape_cast %22 : vector<16x16xf32> to vector<1x16x16xf32>
    tpu.vector_store %arg7[%c0_25, %c0_26, %c0_27], %25 {strides = array<i32>} : memref<1x16x16xf32, #tpu.memory_space<vmem>>, vector<1x16x16xf32>,
    return
  }
  func.func @transform_0(%arg0: i32, %arg1: i32, %arg2: i32) -> (i32, i32, i32) {
    %c0_i32 = arith.constant 0 : i32
    %c0_i32_0 = arith.constant 0 : i32
    return %arg1, %arg2, %c0_i32 : i32, i32, i32
  }
  func.func @transform_1(%arg0: i32, %arg1: i32, %arg2: i32) -> (i32, i32, i32) {
    %c1_i32 = arith.constant 1 : i32
    %0 = arith.addi %arg2, %c1_i32 : i32
    %c2_i32 = arith.constant 2 : i32
    %1 = arith.muli %0, %c2_i32 : i32
    %c0_i32 = arith.constant 0 : i32
    %c0_i32_0 = arith.constant 0 : i32
    return %arg1, %1, %c0_i32 : i32, i32, i32
  }
  func.func @transform_2(%arg0: i32, %arg1: i32, %arg2: i32) -> (i32, i32, i32) {
    %c0_i32 = arith.constant 0 : i32
    %c0_i32_0 = arith.constant 0 : i32
    %c0_i32_1 = arith.constant 0 : i32
    return %c0_i32, %c0_i32_0, %arg0 : i32, i32, i32
  }
  func.func @transform_3(%arg0: i32, %arg1: i32, %arg2: i32) -> (i32, i32) {
    %c0_i32 = arith.constant 0 : i32
    %c0_i32_0 = arith.constant 0 : i32
    return %c0_i32, %arg0 : i32, i32
  }
  func.func @transform_4(%arg0: i32, %arg1: i32, %arg2: i32) -> (i32, i32, i32) {
    %c0_i32 = arith.constant 0 : i32
    return %arg1, %arg2, %arg0 : i32, i32, i32
  }
}

module attributes {stable_mosaic.version = 11 : i64} {
  func.func @_conv1d_kernel(%arg0: i32, %arg1: i32, %arg2: i32, %arg3: memref<1x16x8xf32, #tpu.memory_space<vmem>>, %arg4: memref<1x8x8xf32, #tpu.memory_space<vmem>>, %arg5: memref<3x8x16xf32, #tpu.memory_space<vmem>>, %arg6: memref<1x16xf32, #tpu.memory_space<vmem>>, %arg7: memref<1x16x16xf32, #tpu.memory_space<vmem>>, %arg8: memref<24x8xf32, #tpu.memory_space<vmem>>) attributes {dimension_semantics = [#tpu.dimension_semantics<parallel>, #tpu.dimension_semantics<parallel>, #tpu.dimension_semantics<parallel>], iteration_bounds = array<i64: 1, 2, 1>, scalar_prefetch = 0 : i64, scratch_operands = 1 : i64, tpu.core_type = #tpu.core_type<tc>, window_params = [{transform_indices = @transform_0, window_bounds = array<i64: 1, 16, 8>}, {transform_indices = @transform_1, window_bounds = array<i64: 1, 8, 8>}, {transform_indices = @transform_2, window_bounds = array<i64: 3, 8, 16>}, {transform_indices = @transform_3, window_bounds = array<i64: 1, 16>}, {transform_indices = @transform_4, window_bounds = array<i64: 1, 16, 16>}]} {
    %c0 = arith.constant 0 : index
    %c0_0 = arith.constant 0 : index
    %c0_1 = arith.constant 0 : index
    %0 = vector.load %arg3[%c0, %c0_0, %c0_1] : memref<1x16x8xf32, #tpu.memory_space<vmem>>, vector<1x16x8xf32>
    %1 = vector.shape_cast %0 : vector<1x16x8xf32> to vector<16x8xf32>
    %c0_2 = arith.constant 0 : index
    %c0_3 = arith.constant 0 : index
    %2 = vector.load %arg8[%c0_2, %c0_3] : memref<24x8xf32, #tpu.memory_space<vmem>>, vector<16x8xf32>
    tpu.vector_store %arg8[%c0_2, %c0_3], %1 {strides = array<i32>} : memref<24x8xf32, #tpu.memory_space<vmem>>, vector<16x8xf32>,
    %c0_4 = arith.constant 0 : index
    %c0_5 = arith.constant 0 : index
    %c0_6 = arith.constant 0 : index
    %3 = vector.load %arg4[%c0_4, %c0_5, %c0_6] : memref<1x8x8xf32, #tpu.memory_space<vmem>>, vector<1x8x8xf32>
    %4 = vector.shape_cast %3 : vector<1x8x8xf32> to vector<8x8xf32>
    %c16 = arith.constant 16 : index
    %c0_7 = arith.constant 0 : index
    %5 = vector.load %arg8[%c16, %c0_7] : memref<24x8xf32, #tpu.memory_space<vmem>>, vector<8x8xf32>
    tpu.vector_store %arg8[%c16, %c0_7], %4 {strides = array<i32>} : memref<24x8xf32, #tpu.memory_space<vmem>>, vector<8x8xf32>,
    %c0_8 = arith.constant 0 : index
    %c0_9 = arith.constant 0 : index
    %6 = vector.load %arg8[%c0_8, %c0_9] : memref<24x8xf32, #tpu.memory_space<vmem>>, vector<16x8xf32>
    %c0_10 = arith.constant 0 : index
    %c0_11 = arith.constant 0 : index
    %c0_12 = arith.constant 0 : index
    %7 = vector.load %arg5[%c0_10, %c0_11, %c0_12] : memref<3x8x16xf32, #tpu.memory_space<vmem>>, vector<1x8x16xf32>
    %8 = vector.shape_cast %7 : vector<1x8x16xf32> to vector<8x16xf32>
    %cst = arith.constant dense<0.000000e+00> : vector<16x16xf32>
    %9 = tpu.matmul %6, %8, %cst {dimension_numbers = #tpu.dot_dimension_numbers<[1], [0], [0], [1], [0, 0, 1, 1], [], []>} : vector<16x8xf32>, vector<8x16xf32>, vector<16x16xf32> -> vector<16x16xf32>
    %c1 = arith.constant 1 : index
    %c0_13 = arith.constant 0 : index
    %10 = vector.load %arg8[%c1, %c0_13] : memref<24x8xf32, #tpu.memory_space<vmem>>, vector<16x8xf32>
    %c1_14 = arith.constant 1 : index
    %c0_15 = arith.constant 0 : index
    %c0_16 = arith.constant 0 : index
    %11 = vector.load %arg5[%c1_14, %c0_15, %c0_16] : memref<3x8x16xf32, #tpu.memory_space<vmem>>, vector<1x8x16xf32>
    %12 = vector.shape_cast %11 : vector<1x8x16xf32> to vector<8x16xf32>
    %cst_17 = arith.constant dense<0.000000e+00> : vector<16x16xf32>
    %13 = tpu.matmul %10, %12, %cst_17 {dimension_numbers = #tpu.dot_dimension_numbers<[1], [0], [0], [1], [0, 0, 1, 1], [], []>} : vector<16x8xf32>, vector<8x16xf32>, vector<16x16xf32> -> vector<16x16xf32>
    %14 = arith.addf %9, %13 : vector<16x16xf32>
    %c2 = arith.constant 2 : index
    %c0_18 = arith.constant 0 : index
    %15 = vector.load %arg8[%c2, %c0_18] : memref<24x8xf32, #tpu.memory_space<vmem>>, vector<16x8xf32>
    %c2_19 = arith.constant 2 : index
    %c0_20 = arith.constant 0 : index
    %c0_21 = arith.constant 0 : index
    %16 = vector.load %arg5[%c2_19, %c0_20, %c0_21] : memref<3x8x16xf32, #tpu.memory_space<vmem>>, vector<1x8x16xf32>
    %17 = vector.shape_cast %16 : vector<1x8x16xf32> to vector<8x16xf32>
    %cst_22 = arith.constant dense<0.000000e+00> : vector<16x16xf32>
    %18 = tpu.matmul %15, %17, %cst_22 {dimension_numbers = #tpu.dot_dimension_numbers<[1], [0], [0], [1], [0, 0, 1, 1], [], []>} : vector<16x8xf32>, vector<8x16xf32>, vector<16x16xf32> -> vector<16x16xf32>
    %19 = arith.addf %14, %18 : vector<16x16xf32>
    %c0_23 = arith.constant 0 : index
    %c0_24 = arith.constant 0 : index
    %20 = vector.load %arg6[%c0_23, %c0_24] : memref<1x16xf32, #tpu.memory_space<vmem>>, vector<1x16xf32>
    %21 = vector.broadcast %20 : vector<1x16xf32> to vector<16x16xf32>
    %22 = arith.addf %19, %21 : vector<16x16xf32>
    %c0_25 = arith.constant 0 : index
    %c0_26 = arith.constant 0 : index
    %c0_27 = arith.constant 0 : index
    %23 = vector.load %arg7[%c0_25, %c0_26, %c0_27] : memref<1x16x16xf32, #tpu.memory_space<vmem>>, vector<1x16x16xf32>
    %24 = vector.shape_cast %23 : vector<1x16x16xf32> to vector<16x16xf32>
    %25 = vector.shape_cast %22 : vector<16x16xf32> to vector<1x16x16xf32>
    tpu.vector_store %arg7[%c0_25, %c0_26, %c0_27], %25 {strides = array<i32>} : memref<1x16x16xf32, #tpu.memory_space<vmem>>, vector<1x16x16xf32>,
    return
  }
  func.func @transform_0(%arg0: i32, %arg1: i32, %arg2: i32) -> (i32, i32, i32) {
    %c0_i32 = arith.constant 0 : i32
    %c0_i32_0 = arith.constant 0 : i32
    return %arg1, %arg2, %c0_i32 : i32, i32, i32
  }
  func.func @transform_1(%arg0: i32, %arg1: i32, %arg2: i32) -> (i32, i32, i32) {
    %c1_i32 = arith.constant 1 : i32
    %0 = arith.addi %arg2, %c1_i32 : i32
    %c2_i32 = arith.constant 2 : i32
    %1 = arith.muli %0, %c2_i32 : i32
    %c0_i32 = arith.constant 0 : i32
    %c0_i32_0 = arith.constant 0 : i32
    return %arg1, %1, %c0_i32 : i32, i32, i32
  }
  func.func @transform_2(%arg0: i32, %arg1: i32, %arg2: i32) -> (i32, i32, i32) {
    %c0_i32 = arith.constant 0 : i32
    %c0_i32_0 = arith.constant 0 : i32
    %c0_i32_1 = arith.constant 0 : i32
    return %c0_i32, %c0_i32_0, %arg0 : i32, i32, i32
  }
  func.func @transform_3(%arg0: i32, %arg1: i32, %arg2: i32) -> (i32, i32) {
    %c0_i32 = arith.constant 0 : i32
    %c0_i32_0 = arith.constant 0 : i32
    return %c0_i32, %arg0 : i32, i32
  }
  func.func @transform_4(%arg0: i32, %arg1: i32, %arg2: i32) -> (i32, i32, i32) {
    %c0_i32 = arith.constant 0 : i32
    return %arg1, %arg2, %arg0 : i32, i32, i32
  }
}

</mosaic_0001>

<bundles_post_ra>
// kernel: tpu_custom_call.1
= control target key start
LH: loop header
LB: loop body
LE: loop exit
PB: predicated region body
PF: predicated region fallthrough
CT: control target
= control target key end

     0   :  { %9 = vsyncpa [#allocation4], 0  ;;  %s1107_s0 = inlined_call_operand.vmem [shape: f32[2,24,8], index: 0, kind: input, shape index: {}]   ;;  %s1108_s1 = inlined_call_operand.vmem [shape: f32[2,24,8], index: 1, kind: input, shape index: {}]   ;;  %s1109_s2 = inlined_call_operand.vmem [shape: f32[3,8,16], index: 2, kind: input, shape index: {}]   ;;  %s1110_s3 = inlined_call_operand.vmem [shape: f32[1,16], index: 3, kind: input, shape index: {}]   ;;  %s1111_s4 = inlined_call_operand.hbm [shape: f32[2,16,16], index: 4, kind: output, shape index: {}]  }
   0x1   :  { %11 = vsyncpa [#allocation4 + $0x1], 0  ;;  %s969_s15 = smov 0   ;;  %s971_s16 = smov 0  }
   0x2   :  { %s973_s17 = smov 0   ;;  %s975_s18 = smov 0  }
   0x3   :  { %s977_s19 = smov 0   ;;  %s979_s20 = smov 0  }
   0x4 LB: > { %s752_s21 = sadd.s32 4294967295, %s939_s20   ;;  %s753_s22 = sadd.s32 4294967294, %s939_s20   ;;  %s939_s20 = sphi %s979_s20, %s17_s20   ;;  %s935_s19 = sphi %s977_s19, %s1118_s19   ;;  %s931_s18 = sphi %s975_s18, %s1117_s18   ;;  %s927_s17 = sphi %s973_s17, %s1116_s17   ;;  %s923_s16 = sphi %s971_s16, %s1115_s16   ;;  %s919_s15 = sphi %s969_s15, %s1114_s15  }
   0x5   : > { %s32_s23 = sadd.s32 1, %s935_s19  ;;  %s159_s24 = sadd.s32 1, %s927_s17 }
   0x6   : > { %p34_p0 = scmp.ge.s32.totalorder %s32_s23, 2  ;;  %p169_p1 = scmp.ne.s32.totalorder %s927_s17, %s923_s16 }
   0x7   : > { %p170_p2 = scmp.eq.s32.totalorder %s752_s21, 1  ;;  %p175_p3 = scmp.ne.s32.totalorder %s923_s16, %s919_s15 }
   0x8   : > { %s1120_s23 = smov (%p34_p0, %s32_s23), 0  ;;  %p176_p5 = scmp.eq.s32.totalorder %s753_s22, 1 }
   0x9   : > { %p1009_p4 = por %p170_p2, %p169_p1  ;;  %s152_s26 = ssub.s32 %s935_s19, %s1120_s23 }
   0xa   : > { %p758_p6 = scmp.ge.s32.totalorder %s939_s20, 1  ;;  %p157_p7 = scmp.eq.s32.totalorder %s152_s26, 0 }
   0xb   : > { %p1016_p8 = por %p176_p5, %p175_p3  ;;  %p243_p9 = scmp.lt.s32.totalorder %s939_s20, 3 }
   0xc   : > { %s1022_s28 = scalar_select %p157_p7, %s927_s17, %s159_s24  }
   0xd   : > { %p244_p10 = pnand %p758_p6, %p243_p9 }
   0xe   : > { %p299_p11 = scmp.lt.s32.totalorder (!%p244_p10), %s931_s18, 1  ;;  %s291_s26 = sand.u32 (!%p244_p10), 1, %s923_s16  }
   0xf   : > { %247 = sbr.rel (%p244_p10) target bundleno = 253 (0xfd), region = 36  ;;  %s759_s29 = sshll.u32 (!%p244_p10), %s291_s26, 4 }
  0x10   : > { %s293_s6 = scalar_lea.vmem (!%p244_p10), [#allocation3], %s759_s29  ;;  %s778_s8 = sshll.u32 (!%p244_p10), %s931_s18, 8 }
  0x11   : > { %s624_s7 = sshll.u32 (!%p244_p10), %s293_s6, 4  ;;  %s1058_s11 = scalar_lea.hbm (!%p244_p10), %s1111_s4, %s778_s8  ;;  %s1060_s7 = int_to_ptr.vmem [resolvable:$true] %s624_s7 }
  0x12   : > { %s1062_s12 = scalar_lea.sflag (!%p244_p10), [#allocation4], %s291_s26 }
  0x14   : > { %v762_v0 = vld [vmem:[%s1109_s2 + $0x8] sm:$0xff]  ;;  %v341_v1 = vld [vmem:[%s1109_s2] sm:$0xff]  ;;  %v767_v2 = vld [vmem:[%s1109_s2 + $0x10] sm:$0xff]  ;;  %s300_s9 = scalar_select %p299_p11, %s931_s18, 1  ;;  %vm334_vm0 = vcmask 64512   ;;  %vm604_vm1 = vcmask 130048  }
  0x15   : > { %788 = vmatprep.subr.mxu0 %v762_v0  ;;  %793 = vmatprep.subr.mxu1 %v341_v1  ;;  %v770_v18 = vld [vmem:[%s1110_s3] ss:$0 sm:$0xff]  ;;  %s863_s18 = scalar_lea.vmem %s1060_s7, 256 }
  0x16   : > { %789 = vmatpush3.msra.mxu0 %v762_v0  ;;  %794 = vmatpush3.msra.mxu1 %v341_v1  ;;  %s803_s10 = smul.u32 24, %s300_s9  ;;  %p864_p12 = scmp.ne.s32.totalorder %s1060_s7, %s863_s18 }
  0x17   : > { %798 = vmatprep.subr.mxu0 %v767_v2 }
  0x18   : > { %s306_s13 = scalar_lea.vmem %s1107_s0, %s803_s10  ;;  %s777_s14 = sadd.s32 16, %s803_s10 }
  0x19   : > { %v332_v3 = vld [vmem:[%s306_s13] sm:$0xff]  ;;  %v333_v4 = vld [vmem:[%s306_s13 + $0x8] sm:$0xff]  ;;  %s321_s24 = scalar_lea.vmem %s1108_s1, %s777_s14  ;;  %p865_p13 = pnand %p864_p12, %p1009_p4 }
  0x1a   : > { %335 = vst.msk [vmem:[#allocation2] sm:$0xff] %vm334_vm0, %v332_v3  ;;  %336 = vst.msk [vmem:[#allocation2 + $0x8] sm:$0xff] %vm334_vm0, %v333_v4  ;;  %v337_v5 = vld [vmem:[%s321_s24] sm:$0xff]  ;;  %s941_s13 = smov [#allocation3]  }
  0x1b   : > { %338 = vst.msk [vmem:[#allocation2 + $0x10] sm:$0xff] %vm334_vm0, %v337_v5  ;;  %p866_p0 = pneg %p865_p13  ;;  %s867_s14 = sshll.u32 %s941_s13, 4  ;;  %s868_s14 = int_to_ptr.vmem [resolvable:$false] %s867_s14 }
  0x1c   : > { %s869_s21 = scalar_lea.vmem %s868_s14, 512  ;;  %p870_p1 = scmp.lt.s32.totalorder %s1060_s7, %s868_s14 }
  0x1d   : > { %p871_p2 = scmp.lt.s32.totalorder %s869_s21, %s863_s18 }
  0x1f   : > { %p872_p3 = por %p871_p2, %p870_p1 }
  0x21   : > { %v342_v6 = vld [vmem:[#allocation2 + $0x1] sm:$0xff]  ;;  %p873_p5 = pnand %p872_p3, %p866_p0 }
  0x22   : > { %v339_v7 = vld [vmem:[#allocation2] sm:$0xff]  ;;  %v340_v8 = vld [vmem:[#allocation2 + $0x8] sm:$0xff]  ;;  %790 = vmatprep.mubr.msk.f32.mxu0 %vm334_vm0, %v342_v6 }
  0x23   : > { %795 = vmatprep.mubr.msk.f32.mxu1 %vm334_vm0, %v339_v7  ;;  %v343_v9 = vld [vmem:[#allocation2 + $0x9] sm:$0xff] }
  0x24   : > { %v508_v10 = vld [vmem:[#allocation2 + $0x2] sm:$0xff]  ;;  %791 = vmatmul.mubr.msk.f32.vlgmr.msra.gmra.mxu0 %vm334_vm0, %v343_v9  ;;  %796 = vmatmul.mubr.msk.f32.vlgmr.msra.gmra.mxu1 %vm334_vm0, %v340_v8  ;;  %v509_v11 = vld [vmem:[#allocation2 + $0xa] sm:$0xff] }
  0x25   : > { %799 = vmatpush3.msra.mxu0 %v767_v2  ;;  %800 = vmatprep.mubr.msk.f32.mxu0 %vm334_vm0, %v508_v10 }
  0x28   : > { %801 = vmatmul.mubr.msk.f32.vlgmr.msra.gmra.mxu0 %vm334_vm0, %v509_v11 }
  0xe4   : > { %v792_v12 = vpop.f32.mrf.mxu0  ;;  %v797_v13 = vpop.f32.mrf.mxu1 }
  0xe5   : > { %v505_v16 = vadd.f32 %v797_v13, %v792_v12 }
  0xe6   : > { %v418_v14 = vpop.f32.mrf.mxu0  ;;  %v499_v15 = vpop.f32.mrf.mxu1 }
  0xe7   : > { %v500_v19 = vadd.f32 %v499_v15, %v418_v14 }
  0xe8   : > { %v802_v17 = vpop.f32.mrf.mxu0 }
  0xe9   : > { %v594_v20 = vadd.f32 %v802_v17, %v505_v16 }
  0xea   : > { %v584_v21 = vpop.f32.mrf.mxu0 }
  0xeb   : > { %v603_v22 = vadd.f32 %v770_v18, %v594_v20  ;;  %v593_v23 = vadd.f32 %v584_v21, %v500_v19 }
  0xed   : > { %606 = vst.msk [vmem:[%s293_s6 + $0x8] sm:$0xff] %vm604_vm1, %v603_v22  ;;  %v602_v24 = vadd.f32 %v770_v18, %v593_v23 }
  0xef   : > { %605 = vst.msk [vmem:[%s293_s6] sm:$0xff] %vm604_vm1, %v602_v24 }
  0xf0   : > { %876 = shalt.err (!%p873_p5)
}
  0xf1   : > { %s877_s22 = scalar_lea.hbm %s1058_s11, 256  ;;  %s881_s29 = scalar_lea.hbm %s1111_s4, 512 }
  0xf2   : > { %p878_p6 = scmp.ne.s32.totalorder %s1058_s11, %s877_s22  ;;  %p882_p10 = scmp.lt.s32.totalorder %s1058_s11, %s1111_s4 }
  0xf3   : > { %p883_p11 = scmp.lt.s32.totalorder %s881_s29, %s877_s22 }
  0xf4   : > { %p879_p7 = pnand %p878_p6, %p1009_p4 }
  0xf5   : > { %p884_p12 = por %p883_p11, %p882_p10 }
  0xf6   : > { %p880_p9 = pneg %p879_p7 }
  0xf8   : > { %p885_p13 = pnand %p884_p12, %p880_p9 }
  0xfa   : > { %888 = shalt.err (!%p885_p13)
}
  0xfb   : > { %s942_s6 = smov 128   ;;  %s943_s8 = smov 8  }
  0xfc   : > { %805 = dma.vmem_to_hbm [thread:$0]  (%p1009_p4), %s1060_s7, 256, %s1058_s11, %s1062_s12, %s942_s6, %s942_s6, %s943_s8  }
  0xfd PF: > { %p812_p0 = scmp.ge.s32.totalorder %s939_s20, 2  ;;  %s639_s9 = sand.u32 1, %s919_s15  }
  0xfe   : > { %s640_s10 = scalar_lea.sflag [#allocation4], %s639_s9 }
  0xff   : > { %p808_p1 = pnand %p812_p0, %p1016_p8 }
 0x101   : > { %p809_p2 = pneg %p808_p1 }
 0x103   : > { %914 = dma.done.wait (%p809_p2), %s640_s10, 256  }
 0x104   : > { %916 = vsyncadd (%p809_p2), %s640_s10, 4294967040  ;;  %s17_s20 = sadd.s32 1, %s939_s20   ;;  %s1114_s15 = smov %s923_s16 }
 0x105   : > { %p14_p3 = scmp.ge.s32.totalorder %s17_s20, 4   ;;  %s1115_s16 = smov %s927_s17 }
 0x106   : > { %s1116_s17 = smov %s1022_s28  ;;  %s1117_s18 = smov %s935_s19 }
 0x107   : > { %s1118_s19 = smov %s1120_s23  ;;  %16 = sbr.rel (!%p14_p3) target bundleno = 4 (0x4), region = 82 }
 0x10c   :  { %645 = vsyncpa [#allocation4], 1 }
 0x10d   :  { %647 = vsyncpa [#allocation4 + $0x1], 1 }

// kernel: tpu_custom_call.1
= control target key start
LH: loop header
LB: loop body
LE: loop exit
PB: predicated region body
PF: predicated region fallthrough
CT: control target
= control target key end

     0   :  { %9 = vsyncpa [#allocation4], 0  ;;  %s1107_s0 = inlined_call_operand.vmem [shape: f32[2,24,8], index: 0, kind: input, shape index: {}]   ;;  %s1108_s1 = inlined_call_operand.vmem [shape: f32[2,24,8], index: 1, kind: input, shape index: {}]   ;;  %s1109_s2 = inlined_call_operand.vmem [shape: f32[3,8,16], index: 2, kind: input, shape index: {}]   ;;  %s1110_s3 = inlined_call_operand.vmem [shape: f32[1,16], index: 3, kind: input, shape index: {}]   ;;  %s1111_s4 = inlined_call_operand.hbm [shape: f32[2,16,16], index: 4, kind: output, shape index: {}]  }
   0x1   :  { %11 = vsyncpa [#allocation4 + $0x1], 0  ;;  %s969_s15 = smov 0   ;;  %s971_s16 = smov 0  }
   0x2   :  { %s973_s17 = smov 0   ;;  %s975_s18 = smov 0  }
   0x3   :  { %s977_s19 = smov 0   ;;  %s979_s20 = smov 0  }
   0x4 LB: > { %s752_s21 = sadd.s32 4294967295, %s939_s20   ;;  %s753_s22 = sadd.s32 4294967294, %s939_s20   ;;  %s939_s20 = sphi %s979_s20, %s17_s20   ;;  %s935_s19 = sphi %s977_s19, %s1118_s19   ;;  %s931_s18 = sphi %s975_s18, %s1117_s18   ;;  %s927_s17 = sphi %s973_s17, %s1116_s17   ;;  %s923_s16 = sphi %s971_s16, %s1115_s16   ;;  %s919_s15 = sphi %s969_s15, %s1114_s15  }
   0x5   : > { %s32_s23 = sadd.s32 1, %s935_s19  ;;  %s159_s24 = sadd.s32 1, %s927_s17 }
   0x6   : > { %p34_p0 = scmp.ge.s32.totalorder %s32_s23, 2  ;;  %p169_p1 = scmp.ne.s32.totalorder %s927_s17, %s923_s16 }
   0x7   : > { %p170_p2 = scmp.eq.s32.totalorder %s752_s21, 1  ;;  %p175_p3 = scmp.ne.s32.totalorder %s923_s16, %s919_s15 }
   0x8   : > { %s1120_s23 = smov (%p34_p0, %s32_s23), 0  ;;  %p176_p5 = scmp.eq.s32.totalorder %s753_s22, 1 }
   0x9   : > { %p1009_p4 = por %p170_p2, %p169_p1  ;;  %s152_s26 = ssub.s32 %s935_s19, %s1120_s23 }
   0xa   : > { %p758_p6 = scmp.ge.s32.totalorder %s939_s20, 1  ;;  %p157_p7 = scmp.eq.s32.totalorder %s152_s26, 0 }
   0xb   : > { %p1016_p8 = por %p176_p5, %p175_p3  ;;  %p243_p9 = scmp.lt.s32.totalorder %s939_s20, 3 }
   0xc   : > { %s1022_s28 = scalar_select %p157_p7, %s927_s17, %s159_s24  }
   0xd   : > { %p244_p10 = pnand %p758_p6, %p243_p9 }
   0xe   : > { %p299_p11 = scmp.lt.s32.totalorder (!%p244_p10), %s931_s18, 1  ;;  %s291_s26 = sand.u32 (!%p244_p10), 1, %s923_s16  }
   0xf   : > { %247 = sbr.rel (%p244_p10) target bundleno = 253 (0xfd), region = 36  ;;  %s759_s29 = sshll.u32 (!%p244_p10), %s291_s26, 4 }
  0x10   : > { %s293_s6 = scalar_lea.vmem (!%p244_p10), [#allocation3], %s759_s29  ;;  %s778_s8 = sshll.u32 (!%p244_p10), %s931_s18, 8 }
  0x11   : > { %s624_s7 = sshll.u32 (!%p244_p10), %s293_s6, 4  ;;  %s1058_s11 = scalar_lea.hbm (!%p244_p10), %s1111_s4, %s778_s8  ;;  %s1060_s7 = int_to_ptr.vmem [resolvable:$true] %s624_s7 }
  0x12   : > { %s1062_s12 = scalar_lea.sflag (!%p244_p10), [#allocation4], %s291_s26 }
  0x14   : > { %v762_v0 = vld [vmem:[%s1109_s2 + $0x8] sm:$0xff]  ;;  %v341_v1 = vld [vmem:[%s1109_s2] sm:$0xff]  ;;  %v767_v2 = vld [vmem:[%s1109_s2 + $0x10] sm:$0xff]  ;;  %s300_s9 = scalar_select %p299_p11, %s931_s18, 1  ;;  %vm334_vm0 = vcmask 64512   ;;  %vm604_vm1 = vcmask 130048  }
  0x15   : > { %788 = vmatprep.subr.mxu0 %v762_v0  ;;  %793 = vmatprep.subr.mxu1 %v341_v1  ;;  %v770_v18 = vld [vmem:[%s1110_s3] ss:$0 sm:$0xff]  ;;  %s863_s18 = scalar_lea.vmem %s1060_s7, 256 }
  0x16   : > { %789 = vmatpush3.msra.mxu0 %v762_v0  ;;  %794 = vmatpush3.msra.mxu1 %v341_v1  ;;  %s803_s10 = smul.u32 24, %s300_s9  ;;  %p864_p12 = scmp.ne.s32.totalorder %s1060_s7, %s863_s18 }
  0x17   : > { %798 = vmatprep.subr.mxu0 %v767_v2 }
  0x18   : > { %s306_s13 = scalar_lea.vmem %s1107_s0, %s803_s10  ;;  %s777_s14 = sadd.s32 16, %s803_s10 }
  0x19   : > { %v332_v3 = vld [vmem:[%s306_s13] sm:$0xff]  ;;  %v333_v4 = vld [vmem:[%s306_s13 + $0x8] sm:$0xff]  ;;  %s321_s24 = scalar_lea.vmem %s1108_s1, %s777_s14  ;;  %p865_p13 = pnand %p864_p12, %p1009_p4 }
  0x1a   : > { %335 = vst.msk [vmem:[#allocation2] sm:$0xff] %vm334_vm0, %v332_v3  ;;  %336 = vst.msk [vmem:[#allocation2 + $0x8] sm:$0xff] %vm334_vm0, %v333_v4  ;;  %v337_v5 = vld [vmem:[%s321_s24] sm:$0xff]  ;;  %s941_s13 = smov [#allocation3]  }
  0x1b   : > { %338 = vst.msk [vmem:[#allocation2 + $0x10] sm:$0xff] %vm334_vm0, %v337_v5  ;;  %p866_p0 = pneg %p865_p13  ;;  %s867_s14 = sshll.u32 %s941_s13, 4  ;;  %s868_s14 = int_to_ptr.vmem [resolvable:$false] %s867_s14 }
  0x1c   : > { %s869_s21 = scalar_lea.vmem %s868_s14, 512  ;;  %p870_p1 = scmp.lt.s32.totalorder %s1060_s7, %s868_s14 }
  0x1d   : > { %p871_p2 = scmp.lt.s32.totalorder %s869_s21, %s863_s18 }
  0x1f   : > { %p872_p3 = por %p871_p2, %p870_p1 }
  0x21   : > { %v342_v6 = vld [vmem:[#allocation2 + $0x1] sm:$0xff]  ;;  %p873_p5 = pnand %p872_p3, %p866_p0 }
  0x22   : > { %v339_v7 = vld [vmem:[#allocation2] sm:$0xff]  ;;  %v340_v8 = vld [vmem:[#allocation2 + $0x8] sm:$0xff]  ;;  %790 = vmatprep.mubr.msk.f32.mxu0 %vm334_vm0, %v342_v6 }
  0x23   : > { %795 = vmatprep.mubr.msk.f32.mxu1 %vm334_vm0, %v339_v7  ;;  %v343_v9 = vld [vmem:[#allocation2 + $0x9] sm:$0xff] }
  0x24   : > { %v508_v10 = vld [vmem:[#allocation2 + $0x2] sm:$0xff]  ;;  %791 = vmatmul.mubr.msk.f32.vlgmr.msra.gmra.mxu0 %vm334_vm0, %v343_v9  ;;  %796 = vmatmul.mubr.msk.f32.vlgmr.msra.gmra.mxu1 %vm334_vm0, %v340_v8  ;;  %v509_v11 = vld [vmem:[#allocation2 + $0xa] sm:$0xff] }
  0x25   : > { %799 = vmatpush3.msra.mxu0 %v767_v2  ;;  %800 = vmatprep.mubr.msk.f32.mxu0 %vm334_vm0, %v508_v10 }
  0x28   : > { %801 = vmatmul.mubr.msk.f32.vlgmr.msra.gmra.mxu0 %vm334_vm0, %v509_v11 }
  0xe4   : > { %v792_v12 = vpop.f32.mrf.mxu0  ;;  %v797_v13 = vpop.f32.mrf.mxu1 }
  0xe5   : > { %v505_v16 = vadd.f32 %v797_v13, %v792_v12 }
  0xe6   : > { %v418_v14 = vpop.f32.mrf.mxu0  ;;  %v499_v15 = vpop.f32.mrf.mxu1 }
  0xe7   : > { %v500_v19 = vadd.f32 %v499_v15, %v418_v14 }
  0xe8   : > { %v802_v17 = vpop.f32.mrf.mxu0 }
  0xe9   : > { %v594_v20 = vadd.f32 %v802_v17, %v505_v16 }
  0xea   : > { %v584_v21 = vpop.f32.mrf.mxu0 }
  0xeb   : > { %v603_v22 = vadd.f32 %v770_v18, %v594_v20  ;;  %v593_v23 = vadd.f32 %v584_v21, %v500_v19 }
  0xed   : > { %606 = vst.msk [vmem:[%s293_s6 + $0x8] sm:$0xff] %vm604_vm1, %v603_v22  ;;  %v602_v24 = vadd.f32 %v770_v18, %v593_v23 }
  0xef   : > { %605 = vst.msk [vmem:[%s293_s6] sm:$0xff] %vm604_vm1, %v602_v24 }
  0xf0   : > { %876 = shalt.err (!%p873_p5)
}
  0xf1   : > { %s877_s22 = scalar_lea.hbm %s1058_s11, 256  ;;  %s881_s29 = scalar_lea.hbm %s1111_s4, 512 }
  0xf2   : > { %p878_p6 = scmp.ne.s32.totalorder %s1058_s11, %s877_s22  ;;  %p882_p10 = scmp.lt.s32.totalorder %s1058_s11, %s1111_s4 }
  0xf3   : > { %p883_p11 = scmp.lt.s32.totalorder %s881_s29, %s877_s22 }
  0xf4   : > { %p879_p7 = pnand %p878_p6, %p1009_p4 }
  0xf5   : > { %p884_p12 = por %p883_p11, %p882_p10 }
  0xf6   : > { %p880_p9 = pneg %p879_p7 }
  0xf8   : > { %p885_p13 = pnand %p884_p12, %p880_p9 }
  0xfa   : > { %888 = shalt.err (!%p885_p13)
}
  0xfb   : > { %s942_s6 = smov 128   ;;  %s943_s8 = smov 8  }
  0xfc   : > { %805 = dma.vmem_to_hbm [thread:$0]  (%p1009_p4), %s1060_s7, 256, %s1058_s11, %s1062_s12, %s942_s6, %s942_s6, %s943_s8  }
  0xfd PF: > { %p812_p0 = scmp.ge.s32.totalorder %s939_s20, 2  ;;  %s639_s9 = sand.u32 1, %s919_s15  }
  0xfe   : > { %s640_s10 = scalar_lea.sflag [#allocation4], %s639_s9 }
  0xff   : > { %p808_p1 = pnand %p812_p0, %p1016_p8 }
 0x101   : > { %p809_p2 = pneg %p808_p1 }
 0x103   : > { %914 = dma.done.wait (%p809_p2), %s640_s10, 256  }
 0x104   : > { %916 = vsyncadd (%p809_p2), %s640_s10, 4294967040  ;;  %s17_s20 = sadd.s32 1, %s939_s20   ;;  %s1114_s15 = smov %s923_s16 }
 0x105   : > { %p14_p3 = scmp.ge.s32.totalorder %s17_s20, 4   ;;  %s1115_s16 = smov %s927_s17 }
 0x106   : > { %s1116_s17 = smov %s1022_s28  ;;  %s1117_s18 = smov %s935_s19 }
 0x107   : > { %s1118_s19 = smov %s1120_s23  ;;  %16 = sbr.rel (!%p14_p3) target bundleno = 4 (0x4), region = 82 }
 0x10c   :  { %645 = vsyncpa [#allocation4], 1 }
 0x10d   :  { %647 = vsyncpa [#allocation4 + $0x1], 1 }

</bundles_post_ra>
